<compile_context>
chip_gen: v6e
topology: v6e:2x2x1
jax: 0.10.0
libtpu: 0.0.40
codegen_flags: <defaults>
</compile_context>

<pallas_src>
import functools

import jax
import jax.numpy as jnp
from jax import lax
from jax.experimental import pallas as pl
from jax.experimental.pallas import tpu as pltpu


HIDDEN1, HIDDEN2 = 13, 8          # fixed by the PyTorch module

_SINGLE_BLOCK_MAX = 2048          # below this, one grid step beats any split
_BLOCK_CAP = 32768                # x tile ~2.6 MiB at the cap -- tiny vs. VMEM


def _round8(v):
    return ((v + 7) // 8) * 8


def make_layout(in_features, out_features):
    """Static layout of the single packed parameter buffer.

    Each layer's rows start on a sublane (8-row) boundary so the in-kernel slices do
    not straddle sublane tiles; each layer's bias lives in the column right after its
    weight block.
    """
    r2 = _round8(HIDDEN1)                       # start row of layer-2 params (16)
    r3 = r2 + _round8(HIDDEN2)                  # start row of output-layer params (24)
    rows = r3 + _round8(out_features)           # 32 for out_features=3
    width = max(in_features, HIDDEN1, HIDDEN2) + 1   # 21 (extra column = bias)
    return (in_features, HIDDEN1, HIDDEN2, out_features, r2, r3, rows, width)


def pack_params(layout, w1, b1, w2, b2, w3, b3):
    """Pack all six weights/biases into ONE small f32 buffer (done once at init).

    Collapses six sub-2KB parameter DMAs in the Pallas prologue into a single DMA.
    """
    in_f, h1, h2, out_f, r2, r3, rows, width = layout
    p = jnp.zeros((rows, width), jnp.float32)
    p = p.at[0:h1, 0:in_f].set(w1)
    p = p.at[0:h1, in_f].set(b1)
    p = p.at[r2:r2 + h2, 0:h1].set(w2)
    p = p.at[r2:r2 + h2, h1].set(b2)
    p = p.at[r3:r3 + out_f, 0:h2].set(w3)
    p = p.at[r3:r3 + out_f, h2].set(b3)
    return p


def _mlp_kernel(x_ref, p_ref, o_ref, *, layout):
    in_f, h1_f, h2_f, out_f, r2, r3, _, _ = layout

    p = p_ref[...]                                   # (rows, width) packed params
    w1 = p[0:h1_f, 0:in_f]
    b1 = p[0:h1_f, in_f:in_f + 1]                    # (h1, 1): lane-broadcast bias
    w2 = p[r2:r2 + h2_f, 0:h1_f]
    b2 = p[r2:r2 + h2_f, h1_f:h1_f + 1]
    w3 = p[r3:r3 + out_f, 0:h2_f]
    b3 = p[r3:r3 + out_f, h2_f:h2_f + 1]

    x = x_ref[...]                                   # (block_n, in_f): native HBM layout

    # linear1 + ReLU.  Contract on the in_f axis of BOTH operands (w1 @ x^T): the
    # activation comes out feature-major (h1, block_n), batch on the 128-lane axis, and
    # the "transpose" rides the matmul path instead of a wrapper-side XLA transpose.
    h1 = lax.dot_general(w1, x, (((1,), (1,)), ((), ())),
                         preferred_element_type=jnp.float32) + b1
    h1 = jnp.maximum(h1, 0.0)                        # (h1, block_n)

    # linear2 + sigmoid : (h2, h1) @ (h1, block_n) -> (h2, block_n)
    h2 = jnp.dot(w2, h1, preferred_element_type=jnp.float32) + b2
    h2 = jax.nn.sigmoid(h2)

    # output linear : (out_f, h2) @ (h2, block_n)  -> lane-dense (out_f, block_n) store
    o_ref[...] = (jnp.dot(w3, h2, preferred_element_type=jnp.float32)
                  + b3).astype(o_ref.dtype)


def _choose_block_n(n):
    """Multi-block path only: largest lane-aligned tile that still gives >= 2 steps."""
    half = ((pl.cdiv(n, 2) + 127) // 128) * 128
    return max(128, min(_BLOCK_CAP, half))


@functools.partial(jax.jit, static_argnames=("layout", "block_n"))
def mlp_forward(x, params, *, layout, block_n=None):
    in_f, _, _, out_f, _, _, _, _ = layout
    n = x.shape[0]

    if n <= _SINGLE_BLOCK_MAX:
        # Single grid step; full-extent blocks (legal even when not (8,128)-aligned).
        block_n = n
    elif block_n is None:
        block_n = _choose_block_n(n)
    grid = (pl.cdiv(n, block_n),)

    kernel = functools.partial(_mlp_kernel, layout=layout)

    out_t = pl.pallas_call(
        kernel,
        out_shape=jax.ShapeDtypeStruct((out_f, n), jnp.float32),
        grid_spec=pltpu.PrefetchScalarGridSpec(
            num_scalar_prefetch=0,
            grid=grid,
            in_specs=[
                pl.BlockSpec((block_n, in_f), lambda i: (i, 0)),   # x, native layout
                pl.BlockSpec(params.shape, lambda i: (0, 0)),      # resident packed params
            ],
            out_specs=pl.BlockSpec((out_f, block_n), lambda i: (0, i)),
        ),
        compiler_params=pltpu.CompilerParams(
            dimension_semantics=("parallel",),   # batch tiles shard across v7x's 2 TCs
        ),
    )(x, params)

    # Tiny (out_f, n) -> (n, out_f) relayout back to the PyTorch convention.
    return jnp.transpose(out_t)


def init_linear_params(key, fan_in, fan_out):
    """Mimics nn.Linear default init: U(-1/sqrt(fan_in), 1/sqrt(fan_in))."""
    kw, kb = jax.random.split(key)
    bound = 1.0 / jnp.sqrt(jnp.float32(fan_in))
    w = jax.random.uniform(kw, (fan_out, fan_in), jnp.float32, -bound, bound)
    b = jax.random.uniform(kb, (fan_out,), jnp.float32, -bound, bound)
    return w, b


def reference_forward(x, w1, b1, w2, b2, w3, b3):
    h1 = jnp.maximum(x @ w1.T + b1, 0.0)
    h2 = jax.nn.sigmoid(h1 @ w2.T + b2)
    return h2 @ w3.T + b3


if __name__ == "__main__":
    in_features = 20     # X.shape[1] in the PyTorch script
    out_features = 3     # len(y.unique()) with labels in {0, 1, 2}
    batch = 500          # original (non-aligned) batch -> single-block fast path

    key = jax.random.PRNGKey(0)
    kx, k1, k2, k3 = jax.random.split(key, 4)

    x = jax.random.uniform(kx, (batch, in_features), jnp.float32)   # like torch.rand
    w1, b1 = init_linear_params(k1, in_features, HIDDEN1)
    w2, b2 = init_linear_params(k2, HIDDEN1, HIDDEN2)
    w3, b3 = init_linear_params(k3, HIDDEN2, out_features)

    layout = make_layout(in_features, out_features)
    params = pack_params(layout, w1, b1, w2, b2, w3, b3)   # packed once at init

    # Small-batch (single-block) path -- the module's actual shapes.
    zhat = mlp_forward(x, params, layout=layout)
    zhat = jax.block_until_ready(zhat)
    ref = reference_forward(x, w1, b1, w2, b2, w3, b3)
    assert zhat.shape == (batch, out_features)
    assert jnp.allclose(zhat, ref, atol=1e-5, rtol=1e-5), "mismatch vs. JAX reference"

    # Large-batch (multi-block, unpadded partial-last-tile) path sanity check.
    big_n = 5000
    xb = jax.random.uniform(jax.random.PRNGKey(1), (big_n, in_features), jnp.float32)
    zb = jax.block_until_ready(mlp_forward(xb, params, layout=layout))
    refb = reference_forward(xb, w1, b1, w2, b2, w3, b3)
    assert zb.shape == (big_n, out_features)
    assert jnp.allclose(zb, refb, atol=1e-5, rtol=1e-5), "mismatch (multi-block path)"

    print("KERNEL_OK")
</pallas_src>

<mosaic_0001>
module attributes {stable_mosaic.version = 11 : i64} {
  func.func @_mlp_kernel(%arg0: i32, %arg1: memref<500x20xf32, #tpu.memory_space<vmem>>, %arg2: memref<32x21xf32, #tpu.memory_space<vmem>>, %arg3: memref<3x500xf32, #tpu.memory_space<vmem>>) attributes {dimension_semantics = [#tpu.dimension_semantics<parallel>], iteration_bounds = array<i64: 1>, scalar_prefetch = 0 : i64, scratch_operands = 0 : i64, tpu.core_type = #tpu.core_type<tc>, window_params = [{transform_indices = @transform_0, window_bounds = array<i64: 500, 20>}, {pipeline_mode = #tpu.pipeline_mode<synchronous>, transform_indices = @transform_1, window_bounds = array<i64: 32, 21>}, {transform_indices = @transform_2, window_bounds = array<i64: 3, 500>}]} {
    %c0 = arith.constant 0 : index
    %c0_0 = arith.constant 0 : index
    %0 = vector.load %arg2[%c0, %c0_0] : memref<32x21xf32, #tpu.memory_space<vmem>>, vector<32x21xf32>
    %1 = vector.extract_strided_slice %0 {offsets = [0, 0], sizes = [13, 20], strides = [1, 1]} : vector<32x21xf32> to vector<13x20xf32>
    %2 = vector.extract_strided_slice %0 {offsets = [0, 20], sizes = [13, 1], strides = [1, 1]} : vector<32x21xf32> to vector<13x1xf32>
    %3 = vector.extract_strided_slice %0 {offsets = [16, 0], sizes = [8, 13], strides = [1, 1]} : vector<32x21xf32> to vector<8x13xf32>
    %4 = vector.extract_strided_slice %0 {offsets = [16, 13], sizes = [8, 1], strides = [1, 1]} : vector<32x21xf32> to vector<8x1xf32>
    %5 = vector.extract_strided_slice %0 {offsets = [24, 0], sizes = [3, 8], strides = [1, 1]} : vector<32x21xf32> to vector<3x8xf32>
    %6 = vector.extract_strided_slice %0 {offsets = [24, 8], sizes = [3, 1], strides = [1, 1]} : vector<32x21xf32> to vector<3x1xf32>
    %c0_1 = arith.constant 0 : index
    %c0_2 = arith.constant 0 : index
    %7 = vector.load %arg1[%c0_1, %c0_2] : memref<500x20xf32, #tpu.memory_space<vmem>>, vector<500x20xf32>
    %cst = arith.constant dense<0.000000e+00> : vector<13x500xf32>
    %8 = tpu.matmul %1, %7, %cst {dimension_numbers = #tpu.dot_dimension_numbers<[1], [1], [0], [0], [0, 0, 1, 0], [], []>} : vector<13x20xf32>, vector<500x20xf32>, vector<13x500xf32> -> vector<13x500xf32>
    %9 = vector.broadcast %2 : vector<13x1xf32> to vector<13x500xf32>
    %10 = arith.addf %8, %9 : vector<13x500xf32>
    %cst_3 = arith.constant 0.000000e+00 : f32
    %11 = vector.broadcast %cst_3 : f32 to vector<13x500xf32>
    %12 = arith.maximumf %10, %11 : vector<13x500xf32>
    %cst_4 = arith.constant dense<0.000000e+00> : vector<8x500xf32>
    %13 = tpu.matmul %3, %12, %cst_4 {dimension_numbers = #tpu.dot_dimension_numbers<[1], [0], [0], [1], [0, 0, 1, 1], [], []>} : vector<8x13xf32>, vector<13x500xf32>, vector<8x500xf32> -> vector<8x500xf32>
    %14 = vector.broadcast %4 : vector<8x1xf32> to vector<8x500xf32>
    %15 = arith.addf %13, %14 : vector<8x500xf32>
    %16 = arith.negf %15 : vector<8x500xf32>
    %17 = math.exp %16 : vector<8x500xf32>
    %cst_5 = arith.constant 1.000000e+00 : f32
    %18 = vector.broadcast %cst_5 : f32 to vector<8x500xf32>
    %19 = arith.addf %18, %17 : vector<8x500xf32>
    %20 = arith.divf %18, %19 : vector<8x500xf32>
    %cst_6 = arith.constant dense<0.000000e+00> : vector<3x500xf32>
    %21 = tpu.matmul %5, %20, %cst_6 {dimension_numbers = #tpu.dot_dimension_numbers<[1], [0], [0], [1], [0, 0, 1, 1], [], []>} : vector<3x8xf32>, vector<8x500xf32>, vector<3x500xf32> -> vector<3x500xf32>
    %22 = vector.broadcast %6 : vector<3x1xf32> to vector<3x500xf32>
    %23 = arith.addf %21, %22 : vector<3x500xf32>
    %c0_7 = arith.constant 0 : index
    %c0_8 = arith.constant 0 : index
    %24 = vector.load %arg3[%c0_7, %c0_8] : memref<3x500xf32, #tpu.memory_space<vmem>>, vector<3x500xf32>
    tpu.vector_store %arg3[%c0_7, %c0_8], %23 {strides = array<i32>} : memref<3x500xf32, #tpu.memory_space<vmem>>, vector<3x500xf32>,
    return
  }
  func.func @transform_0(%arg0: i32) -> (i32, i32) {
    %c0_i32 = arith.constant 0 : i32
    %c0_i32_0 = arith.constant 0 : i32
    return %arg0, %c0_i32 : i32, i32
  }
  func.func @transform_1(%arg0: i32) -> (i32, i32) {
    %c0_i32 = arith.constant 0 : i32
    %c0_i32_0 = arith.constant 0 : i32
    %c0_i32_1 = arith.constant 0 : i32
    return %c0_i32, %c0_i32_0 : i32, i32
  }
  func.func @transform_2(%arg0: i32) -> (i32, i32) {
    %c0_i32 = arith.constant 0 : i32
    %c0_i32_0 = arith.constant 0 : i32
    return %c0_i32, %arg0 : i32, i32
  }
}

</mosaic_0001>

<bundles_post_ra>
// kernel: mlp_forward.1
= control target key start
LH: loop header
LB: loop body
LE: loop exit
PB: predicated region body
PF: predicated region fallthrough
CT: control target
= control target key end

     0   :  { %vm89_vm0 = vcmask 162816   ;;  %v971_v1 = vmov 0.0   ;;  %v972_v2 = vmov 20   ;;  %s1321_s0 = inlined_call_operand.vmem [shape: f32[500,20], index: 0, kind: input, shape index: {}]   ;;  %s1322_s1 = inlined_call_operand.vmem [shape: f32[32,21], index: 1, kind: input, shape index: {}]   ;;  %s1323_s2 = inlined_call_operand.hbm [shape: f32[3,500], index: 2, kind: output, shape index: {}]  }
   0x1   :  { %v63_v0 = vld [vmem:[%s1321_s0 + $0x178] sm:$0xff]  ;;  %360 = vmatprep.subr.mxu1 %v971_v1  ;;  %424 = vmatprep.mubr.f32.mxu1 %v971_v1  ;;  %v62_v3 = vld [vmem:[%s1321_s0 + $0x170] sm:$0xff]  ;;  %v61_v8 = vld [vmem:[%s1321_s0 + $0x168] sm:$0xff] }
   0x2   :  { %843 = vmatpush1.xpose.msk.msra.mxu1 %vm89_vm0, %v63_v0  ;;  %929 = vset.pattern.permute.xlu0 %v972_v2  ;;  %v47_v4 = vld [vmem:[%s1321_s0 + $0xf8] sm:$0xff]  ;;  %v46_v6 = vld [vmem:[%s1321_s0 + $0xf0] sm:$0xff]  ;;  %v45_v9 = vld [vmem:[%s1321_s0 + $0xe8] sm:$0xff] }
   0x3   :  { %362 = vmatprep.subr.mxu1 %v971_v1  ;;  %888 = vmatprep.subr.msk.mxu0 %vm89_vm0, %v47_v4  ;;  %v31_v5 = vld [vmem:[%s1321_s0 + $0x78] sm:$0xff]  ;;  %v30_v7 = vld [vmem:[%s1321_s0 + $0x70] sm:$0xff]  ;;  %v29_v10 = vld [vmem:[%s1321_s0 + $0x68] sm:$0xff] }
   0x4   :  { %889 = vmatpush3.xpose.msk.msra.mxu0 %vm89_vm0, %v31_v5  ;;  %v60_v11 = vld [vmem:[%s1321_s0 + $0x160] sm:$0xff]  ;;  %v59_v14 = vld [vmem:[%s1321_s0 + $0x158] sm:$0xff]  ;;  %v58_v17 = vld [vmem:[%s1321_s0 + $0x150] sm:$0xff] }
   0x5   :  { %890 = vmatprep.subr.msk.mxu0 %vm89_vm0, %v46_v6  ;;  %v44_v12 = vld [vmem:[%s1321_s0 + $0xe0] sm:$0xff]  ;;  %v43_v15 = vld [vmem:[%s1321_s0 + $0xd8] sm:$0xff]  ;;  %v42_v18 = vld [vmem:[%s1321_s0 + $0xd0] sm:$0xff] }
   0x6   :  { %844 = vmatpush1.xpose.msk.msra.mxu1 %vm89_vm0, %v62_v3  ;;  %v28_v13 = vld [vmem:[%s1321_s0 + $0x60] sm:$0xff]  ;;  %v27_v16 = vld [vmem:[%s1321_s0 + $0x58] sm:$0xff]  ;;  %v1073_v20 = vld [vmem:[%s1322_s1 + $0x8] sm:$0xff] }
   0x7   :  { %364 = vmatprep.subr.mxu1 %v971_v1  ;;  %v1066_v19 = vld [vmem:[%s1322_s1] sm:$0xff]  ;;  %86 = vperm.xlu0 %929, %v1073_v20  }
   0x8   :  { %891 = vmatpush3.xpose.msk.msra.mxu0 %vm89_vm0, %v30_v7  ;;  %920 = vmatprep.mubr.msk.f32.mxu0 %vm89_vm0, %v1066_v19 }
   0x9   :  { %892 = vmatprep.subr.msk.mxu0 %vm89_vm0, %v45_v9 }
   0xa   :  { %845 = vmatpush1.xpose.msk.msra.mxu1 %vm89_vm0, %v61_v8 }
   0xb   :  { %366 = vmatprep.subr.mxu1 %v971_v1 }
   0xc   :  { %893 = vmatpush3.xpose.msk.msra.mxu0 %vm89_vm0, %v29_v10 }
   0xd   :  { %894 = vmatprep.subr.msk.mxu0 %vm89_vm0, %v44_v12 }
   0xe   :  { %846 = vmatpush1.xpose.msk.msra.mxu1 %vm89_vm0, %v60_v11 }
   0xf   :  { %368 = vmatprep.subr.mxu1 %v971_v1 }
  0x10   :  { %895 = vmatpush3.xpose.msk.msra.mxu0 %vm89_vm0, %v28_v13 }
  0x11   :  { %896 = vmatprep.subr.msk.mxu0 %vm89_vm0, %v43_v15 }
  0x12   :  { %847 = vmatpush1.xpose.msk.msra.mxu1 %vm89_vm0, %v59_v14 }
  0x13   :  { %370 = vmatprep.subr.mxu1 %v971_v1 }
  0x14   :  { %897 = vmatpush3.xpose.msk.msra.mxu0 %vm89_vm0, %v27_v16 }
  0x15   :  { %7 = vsyncpa [#allocation3], 0  ;;  %898 = vmatprep.subr.msk.mxu0 %vm89_vm0, %v42_v18  ;;  %v26_v21 = vld [vmem:[%s1321_s0 + $0x50] sm:$0xff]  ;;  %v57_v22 = vld [vmem:[%s1321_s0 + $0x148] sm:$0xff]  ;;  %81 = vperm.xlu0 %929, %v1066_v19   ;;  %v973_v5 = vmov 13   ;;  %vm453_vm1 = vcmask 1044480  }
  0x16   :  { %848 = vmatpush1.xpose.msk.msra.mxu1 %vm89_vm0, %v58_v17  ;;  %v41_v23 = vld [vmem:[%s1321_s0 + $0xc8] sm:$0xff]  ;;  %v56_v25 = vld [vmem:[%s1321_s0 + $0x140] sm:$0xff]  ;;  %v55_v28 = vld [vmem:[%s1321_s0 + $0x138] sm:$0xff]  ;;  %930 = vset.pattern.permute.xlu1 %v973_v5  ;;  %vm450_vm2 = vcmask 105472   ;;  %vm637_vm3 = vcmask 64512   ;;  %vm791_vm4 = vcmask 1042432  }
  0x17   :  { %372 = vmatprep.subr.mxu1 %v971_v1  ;;  %v25_v24 = vld [vmem:[%s1321_s0 + $0x48] sm:$0xff]  ;;  %v40_v26 = vld [vmem:[%s1321_s0 + $0xc0] sm:$0xff]  ;;  %v39_v29 = vld [vmem:[%s1321_s0 + $0xb8] sm:$0xff]  ;;  %vm792_vm5 = vcmask 948228  }
  0x18   :  { %899 = vmatpush3.xpose.msk.msra.mxu0 %vm89_vm0, %v26_v21  ;;  %v24_v27 = vld [vmem:[%s1321_s0 + $0x40] sm:$0xff]  ;;  %v23_v30 = vld [vmem:[%s1321_s0 + $0x38] sm:$0xff]  ;;  %v54_v31 = vld [vmem:[%s1321_s0 + $0x130] sm:$0xff] }
  0x19   :  { %900 = vmatprep.subr.msk.mxu0 %vm89_vm0, %v41_v23  ;;  %v38_v32 = vld [vmem:[%s1321_s0 + $0xb0] sm:$0xff]  ;;  %v53_v34 = vld [vmem:[%s1321_s0 + $0x128] sm:$0xff]  ;;  %v52_v37 = vld [vmem:[%s1321_s0 + $0x120] sm:$0xff] }
  0x1a   :  { %849 = vmatpush1.xpose.msk.msra.mxu1 %vm89_vm0, %v57_v22  ;;  %v22_v33 = vld [vmem:[%s1321_s0 + $0x30] sm:$0xff]  ;;  %v37_v35 = vld [vmem:[%s1321_s0 + $0xa8] sm:$0xff]  ;;  %v36_v38 = vld [vmem:[%s1321_s0 + $0xa0] sm:$0xff] }
  0x1b   :  { %374 = vmatprep.subr.mxu1 %v971_v1  ;;  %v21_v36 = vld [vmem:[%s1321_s0 + $0x28] sm:$0xff]  ;;  %v20_v39 = vld [vmem:[%s1321_s0 + $0x20] sm:$0xff]  ;;  %v51_v40 = vld [vmem:[%s1321_s0 + $0x118] sm:$0xff] }
  0x1c   :  { %901 = vmatpush3.xpose.msk.msra.mxu0 %vm89_vm0, %v25_v24  ;;  %v35_v41 = vld [vmem:[%s1321_s0 + $0x98] sm:$0xff]  ;;  %v50_v43 = vld [vmem:[%s1321_s0 + $0x110] sm:$0xff]  ;;  %v49_v46 = vld [vmem:[%s1321_s0 + $0x108] sm:$0xff] }
  0x1d   :  { %902 = vmatprep.subr.msk.mxu0 %vm89_vm0, %v40_v26  ;;  %v19_v42 = vld [vmem:[%s1321_s0 + $0x18] sm:$0xff]  ;;  %v34_v44 = vld [vmem:[%s1321_s0 + $0x90] sm:$0xff]  ;;  %v33_v47 = vld [vmem:[%s1321_s0 + $0x88] sm:$0xff] }
  0x1e   :  { %850 = vmatpush1.xpose.msk.msra.mxu1 %vm89_vm0, %v56_v25  ;;  %v18_v45 = vld [vmem:[%s1321_s0 + $0x10] sm:$0xff]  ;;  %v17_v48 = vld [vmem:[%s1321_s0 + $0x8] sm:$0xff]  ;;  %v48_v49 = vld [vmem:[%s1321_s0 + $0x100] sm:$0xff] }
  0x1f   :  { %376 = vmatprep.subr.mxu1 %v971_v1  ;;  %v32_v50 = vld [vmem:[%s1321_s0 + $0x80] sm:$0xff]  ;;  %v78_v52 = vld [vmem:[%s1321_s0 + $0x1f0] sm:$0xf]  ;;  %v77_v53 = vld [vmem:[%s1321_s0 + $0x1e8] sm:$0xff] }
  0x20   :  { %903 = vmatpush3.xpose.msk.msra.mxu0 %vm89_vm0, %v24_v27  ;;  %v16_v51 = vld [vmem:[%s1321_s0] sm:$0xff]  ;;  %v75_v55 = vld [vmem:[%s1321_s0 + $0x1d8] sm:$0xff]  ;;  %v74_v56 = vld [vmem:[%s1321_s0 + $0x1d0] sm:$0xff] }
  0x21   :  { %904 = vmatprep.subr.msk.mxu0 %vm89_vm0, %v39_v29  ;;  %v76_v54 = vld [vmem:[%s1321_s0 + $0x1e0] sm:$0xff]  ;;  %v73_v57 = vld [vmem:[%s1321_s0 + $0x1c8] sm:$0xff]  ;;  %v71_v59 = vld [vmem:[%s1321_s0 + $0x1b8] sm:$0xff] }
  0x22   :  { %851 = vmatpush1.xpose.msk.msra.mxu1 %vm89_vm0, %v55_v28  ;;  %v72_v58 = vld [vmem:[%s1321_s0 + $0x1c0] sm:$0xff]  ;;  %v70_v60 = vld [vmem:[%s1321_s0 + $0x1b0] sm:$0xff]  ;;  %v69_v61 = vld [vmem:[%s1321_s0 + $0x1a8] sm:$0xff] }
  0x23   :  { %378 = vmatprep.subr.mxu1 %v971_v1  ;;  %v68_v62 = vld [vmem:[%s1321_s0 + $0x1a0] sm:$0xff]  ;;  %v67_v63 = vld [vmem:[%s1321_s0 + $0x198] sm:$0xff]  ;;  %v66_v0 = vld [vmem:[%s1321_s0 + $0x190] sm:$0xff] }
  0x24   :  { %905 = vmatpush3.xpose.msk.msra.mxu0 %vm89_vm0, %v23_v30  ;;  %v65_v2 = vld [vmem:[%s1321_s0 + $0x188] sm:$0xff]  ;;  %v64_v3 = vld [vmem:[%s1321_s0 + $0x180] sm:$0xff]  ;;  %v14_v4 = vld [vmem:[%s1322_s1 + $0x10] sm:$0xff] }
  0x25   :  { %906 = vmatprep.subr.msk.mxu0 %vm89_vm0, %v38_v32  ;;  %447 = vperm.xlu1 %930, %v14_v4   ;;  %v15_v32 = vld [vmem:[%s1322_s1 + $0x18] sm:$0xff]  ;;  %s975_s1 = smov [#allocation2]   ;;  %vm793_vm6 = vmor %vm792_vm5, %vm791_vm4 }
  0x26   :  { %852 = vmatpush1.xpose.msk.msra.mxu1 %vm89_vm0, %v54_v31  ;;  %s801_s30 = sshll.u32 %s975_s1, 4  ;;  %s802_s30 = int_to_ptr.vmem [resolvable:$true] %s801_s30 }
  0x27   :  { %380 = vmatprep.subr.mxu1 %v971_v1  ;;  %s949_s3 = scalar_lea.vmem %s802_s30, 256  ;;  %p954_p1 = scmp.lt.s32.totalorder %s802_s30, %s802_s30 }
  0x28   :  { %907 = vmatpush3.xpose.msk.msra.mxu0 %vm89_vm0, %v22_v33  ;;  %v974_v33 = vmov 8   ;;  %p950_p0 = scmp.ne.s32.totalorder %s802_s30, %s949_s3  ;;  %p955_p2 = scmp.lt.s32.totalorder %s949_s3, %s949_s3 }
  0x29   :  { %908 = vmatprep.subr.msk.mxu0 %vm89_vm0, %v37_v35  ;;  %931 = vset.pattern.permute.xlu1 %v974_v33 }
  0x2a   :  { %853 = vmatpush1.xpose.msk.msra.mxu1 %vm89_vm0, %v53_v34  ;;  %932 = vset.pattern.permute.xlu0 %v974_v33  ;;  %p956_p3 = por %p955_p2, %p954_p1 }
  0x2b   :  { %382 = vmatprep.subr.mxu1 %v971_v1  ;;  %634 = vperm.xlu1 %931, %v15_v32  }
  0x2c   :  { %909 = vmatpush3.xpose.msk.msra.mxu0 %vm89_vm0, %v21_v36  ;;  %p957_p4 = pnand %p956_p3, %p950_p0 }
  0x2d   :  { %910 = vmatprep.subr.msk.mxu0 %vm89_vm0, %v36_v38 }
  0x2e   :  { %854 = vmatpush1.xpose.msk.msra.mxu1 %vm89_vm0, %v52_v37 }
  0x2f   :  { %384 = vmatprep.subr.mxu1 %v971_v1 }
  0x30   :  { %911 = vmatpush3.xpose.msk.msra.mxu0 %vm89_vm0, %v20_v39 }
  0x31   :  { %912 = vmatprep.subr.msk.mxu0 %vm89_vm0, %v35_v41 }
  0x32   :  { %855 = vmatpush1.xpose.msk.msra.mxu1 %vm89_vm0, %v51_v40 }
  0x33   :  { %386 = vmatprep.subr.mxu1 %v971_v1 }
  0x34   :  { %913 = vmatpush3.xpose.msk.msra.mxu0 %vm89_vm0, %v19_v42 }
  0x35   :  { %914 = vmatprep.subr.msk.mxu0 %vm89_vm0, %v34_v44 }
  0x36   :  { %856 = vmatpush1.xpose.msk.msra.mxu1 %vm89_vm0, %v50_v43 }
  0x37   :  { %388 = vmatprep.subr.mxu1 %v971_v1 }
  0x38   :  { %915 = vmatpush3.xpose.msk.msra.mxu0 %vm89_vm0, %v18_v45 }
  0x39   :  { %916 = vmatprep.subr.msk.mxu0 %vm89_vm0, %v33_v47 }
  0x3a   :  { %857 = vmatpush1.xpose.msk.msra.mxu1 %vm89_vm0, %v49_v46 }
  0x3b   :  { %390 = vmatprep.subr.mxu1 %v971_v1 }
  0x3c   :  { %917 = vmatpush3.xpose.msk.msra.mxu0 %vm89_vm0, %v17_v48 }
  0x3d   :  { %918 = vmatprep.subr.msk.mxu0 %vm89_vm0, %v32_v50 }
  0x3e   :  { %858 = vmatpush1.xpose.msk.msra.mxu1 %vm89_vm0, %v48_v49 }
  0x3f   :  { %394 = vmatprep.subr.mxu1 %v971_v1 }
  0x40   :  { %919 = vmatpush3.xpose.msk.msra.mxu0 %vm89_vm0, %v16_v51 }
  0x42   :  { %859 = vmatpush2.xpose.msk.msra.mxu1 %vm89_vm0, %v78_v52 }
  0x43   :  { %396 = vmatprep.subr.mxu1 %v971_v1  ;;  %921 = vmatmul.mubr.msk.f32.vlgmr.msra.gmra.mxu0 %vm89_vm0, %v1066_v19 }
  0x44   :  { %922 = vmatprep.mubr.msk.f32.mxu0 %vm89_vm0, %v1073_v20 }
  0x46   :  { %860 = vmatpush2.xpose.msk.msra.mxu1 %vm89_vm0, %v77_v53 }
  0x47   :  { %398 = vmatprep.subr.mxu1 %v971_v1  ;;  %923 = vmatmul.mubr.msk.f32.gmra.mxu0 %vm89_vm0, %v1073_v20 }
  0x48   :  { %530 = vmatprep.mubr.f32.mxu0 %v971_v1 }
  0x4a   :  { %861 = vmatpush2.xpose.msk.msra.mxu1 %vm89_vm0, %v76_v54 }
  0x4b   :  { %400 = vmatprep.subr.mxu1 %v971_v1 }
  0x4e   :  { %862 = vmatpush2.xpose.msk.msra.mxu1 %vm89_vm0, %v75_v55 }
  0x4f   :  { %402 = vmatprep.subr.mxu1 %v971_v1 }
  0x52   :  { %863 = vmatpush2.xpose.msk.msra.mxu1 %vm89_vm0, %v74_v56 }
  0x53   :  { %404 = vmatprep.subr.mxu1 %v971_v1 }
  0x56   :  { %864 = vmatpush2.xpose.msk.msra.mxu1 %vm89_vm0, %v73_v57 }
  0x57   :  { %406 = vmatprep.subr.mxu1 %v971_v1 }
  0x5a   :  { %865 = vmatpush2.xpose.msk.msra.mxu1 %vm89_vm0, %v72_v58 }
  0x5b   :  { %408 = vmatprep.subr.mxu1 %v971_v1 }
  0x5e   :  { %866 = vmatpush2.xpose.msk.msra.mxu1 %vm89_vm0, %v71_v59 }
  0x5f   :  { %410 = vmatprep.subr.mxu1 %v971_v1 }
  0x62   :  { %867 = vmatpush2.xpose.msk.msra.mxu1 %vm89_vm0, %v70_v60 }
  0x63   :  { %412 = vmatprep.subr.mxu1 %v971_v1 }
  0x66   :  { %868 = vmatpush2.xpose.msk.msra.mxu1 %vm89_vm0, %v69_v61 }
  0x67   :  { %414 = vmatprep.subr.mxu1 %v971_v1 }
  0x6a   :  { %869 = vmatpush2.xpose.msk.msra.mxu1 %vm89_vm0, %v68_v62 }
  0x6b   :  { %416 = vmatprep.subr.mxu1 %v971_v1 }
  0x6e   :  { %870 = vmatpush2.xpose.msk.msra.mxu1 %vm89_vm0, %v67_v63 }
  0x6f   :  { %418 = vmatprep.subr.mxu1 %v971_v1 }
  0x72   :  { %871 = vmatpush2.xpose.msk.msra.mxu1 %vm89_vm0, %v66_v0 }
  0x73   :  { %420 = vmatprep.subr.mxu1 %v971_v1 }
  0x76   :  { %872 = vmatpush2.xpose.msk.msra.mxu1 %vm89_vm0, %v65_v2 }
  0x77   :  { %422 = vmatprep.subr.mxu1 %v971_v1 }
  0x7a   :  { %873 = vmatpush2.xpose.msk.msra.mxu1 %vm89_vm0, %v64_v3 }
  0x7d   :  { %874 = vmatmul.mubr.msk.f32.vlgmr.msra.gmra.mxu1 %vm89_vm0, %v1066_v19 }
  0x7e   :  { %430 = vmatprep.mubr.f32.mxu1 %v971_v1 }
  0x81   :  { %875 = vmatmul.mubr.msk.f32.gmra.mxu1 %vm89_vm0, %v1073_v20 }
  0x82   :  { %v87_v6 = vpop.permute.xlu0 %86 }
  0x90   :  { %v82_v9 = vpop.permute.xlu0 %81 }
  0xa0   :  { %v448_v34 = vpop.permute.xlu1 %447 }
 0x103   :  { %v349_v7 = vpop.f32.mrf.mxu0 }
 0x104   :  { %v350_v14 = vadd.f32 %v349_v7, %v82_v9 }
 0x105   :  { %v351_v8 = vpop.f32.mrf.mxu0 }
 0x106   :  { %v352_v12 = vadd.f32 %v351_v8, %v82_v9  ;;  %v437_v19 = vmax.f32 %v350_v14, 0.0 }
 0x107   :  { %v355_v10 = vpop.f32.mrf.mxu0 }
 0x108   :  { %v356_v11 = vadd.f32 %v355_v10, %v87_v6  ;;  %v438_v18 = vmax.f32 %v352_v12, 0.0 }
 0x109   :  { %v357_v13 = vpop.f32.mrf.mxu0 }
 0x10a   :  { %v358_v15 = vadd.f32 %v357_v13, %v87_v6  ;;  %v441_v16 = vmax.f32 %v356_v11, 0.0 }
 0x10c   :  { %v442_v17 = vmax.f32 %v358_v15, 0.0 }
 0x10e   :  { %876 = vmatprep.subr.msk.mxu0 %vm453_vm1, %v442_v17 }
 0x10f   :  { %877 = vmatpush1.msk.msra.mxu0 %vm453_vm1, %v441_v16 }
 0x110   :  { %496 = vmatprep.subr.mxu0 %v438_v18 }
 0x111   :  { %497 = vmatpush1.msra.mxu0 %v437_v19 }
 0x112   :  { %878 = vmatmul.mubr.msk.f32.vlgmr.msra.gmra.mxu0 %vm450_vm2, %v14_v4 }
 0x113   :  { %601 = vmatprep.mubr.f32.mxu0 %v971_v1 }
 0x13d   :  { %v426_v20 = vpop.f32.mrf.mxu1 }
 0x13e   :  { %v427_v27 = vadd.f32 %v426_v20, %v82_v9 }
 0x13f   :  { %v428_v21 = vpop.f32.mrf.mxu1 }
 0x140   :  { %v429_v25 = vadd.f32 %v428_v21, %v82_v9  ;;  %v439_v31 = vmax.f32 %v427_v27, 0.0 }
 0x141   :  { %v432_v22 = vpop.f32.mrf.mxu1 }
 0x142   :  { %v433_v23 = vadd.f32 %v432_v22, %v87_v6  ;;  %v440_v30 = vmax.f32 %v429_v25, 0.0 }
 0x143   :  { %v434_v24 = vpop.f32.mrf.mxu1 }
 0x144   :  { %v435_v26 = vadd.f32 %v434_v24, %v87_v6  ;;  %v443_v29 = vmax.f32 %v433_v23, 0.0 }
 0x146   :  { %v444_v28 = vmax.f32 %v435_v26, 0.0 }
 0x148   :  { %879 = vmatprep.subr.msk.mxu0 %vm453_vm1, %v444_v28 }
 0x149   :  { %880 = vmatpush1.msk.msra.mxu0 %vm453_vm1, %v443_v29 }
 0x14a   :  { %567 = vmatprep.subr.mxu0 %v440_v30 }
 0x14b   :  { %568 = vmatpush1.msra.mxu0 %v439_v31 }
 0x14c   :  { %881 = vmatmul.mubr.msk.f32.vlgmr.msra.gmra.mxu0 %vm450_vm2, %v14_v4 }
 0x14d   :  { %704 = vmatprep.mubr.f32.mxu0 %v971_v1 }
 0x1d2   :  { %v532_v35 = vpop.f32.mrf.mxu0 }
 0x1d3   :  { %v533_v36 = vadd.f32 %v532_v35, %v448_v34 }
 0x1d4   :  { %v534_v37 = vpop.f32.mrf.mxu0 }
 0x1d5   :  { %v882_v38 = vmul.f32 -1.442695, %v533_v36  ;;  %v535_v39 = vadd.f32 %v534_v37, %v448_v34 }
 0x1d7   :  { %933 = vpow2.f32 %v882_v38  ;;  %v883_v40 = vmul.f32 -1.442695, %v535_v39 }
 0x1d9   :  { %935 = vpow2.f32 %v883_v40 }
 0x1e4   :  { %v934_v41 = vpop.eup %933 }
 0x1e5   :  { %v620_v42 = vadd.f32 1.0, %v934_v41 }
 0x1e6   :  { %v936_v43 = vpop.eup %935 }
 0x1e7   :  { %v621_v44 = vadd.f32 1.0, %v936_v43  ;;  %937 = vrcp.f32 %v620_v42 }
 0x1e9   :  { %939 = vrcp.f32 %v621_v44 }
 0x1f4   :  { %v938_v45 = vpop.eup %937 }
 0x1f6   :  { %v940_v46 = vpop.eup %939 }
 0x1f7   :  { %670 = vmatprep.subr.mxu0 %v940_v46 }
 0x1f8   :  { %671 = vmatpush1.msra.mxu0 %v938_v45 }
 0x1f9   :  { %886 = vmatmul.mubr.msk.f32.vlgmr.msra.gmra.mxu0 %vm637_vm3, %v15_v32 }
 0x1fa   :  { %775 = vmatprep.mubr.f32.mxu0 %v971_v1  ;;  %v635_v1 = vpop.permute.xlu1 %634 }
 0x20c   :  { %v603_v47 = vpop.f32.mrf.mxu0 }
 0x20d   :  { %v604_v48 = vadd.f32 %v603_v47, %v448_v34 }
 0x20e   :  { %v605_v49 = vpop.f32.mrf.mxu0 }
 0x20f   :  { %v884_v50 = vmul.f32 -1.442695, %v604_v48  ;;  %v606_v51 = vadd.f32 %v605_v49, %v448_v34 }
 0x211   :  { %941 = vpow2.f32 %v884_v50  ;;  %v885_v52 = vmul.f32 -1.442695, %v606_v51 }
 0x213   :  { %943 = vpow2.f32 %v885_v52 }
 0x21e   :  { %v942_v53 = vpop.eup %941 }
 0x21f   :  { %v622_v55 = vadd.f32 1.0, %v942_v53 }
 0x220   :  { %v944_v54 = vpop.eup %943 }
 0x221   :  { %v623_v56 = vadd.f32 1.0, %v944_v54 }
 0x223   :  { %945 = vrcp.f32 %v623_v56 }
 0x224   :  { %947 = vrcp.f32 %v622_v55 }
 0x230   :  { %v946_v57 = vpop.eup %945 }
 0x231   :  { %v948_v58 = vpop.eup %947  ;;  %741 = vmatprep.subr.mxu0 %v946_v57 }
 0x232   :  { %742 = vmatpush1.msra.mxu0 %v948_v58 }
 0x233   :  { %887 = vmatmul.mubr.msk.f32.vlgmr.msra.gmra.mxu0 %vm637_vm3, %v15_v32 }
 0x2b9   :  { %v706_v59 = vpop.f32.mrf.mxu0 }
 0x2ba   :  { %v707_v60 = vadd.f32 %v706_v59, %v635_v1 }
 0x2bb   :  { %v708_v61 = vpop.f32.mrf.mxu0 }
 0x2bc   :  { %v709_v62 = vadd.f32 %v708_v61, %v635_v1 }
 0x2be   :  { %v786_v63 = vcombine.low %v707_v60, %v709_v62 }
 0x2c0   :  { %790 = vst [vmem:[#allocation2] sm:$0x77] %v786_v63 }
 0x2f3   :  { %v777_v0 = vpop.f32.mrf.mxu0 }
 0x2f4   :  { %v778_v3 = vadd.f32 %v777_v0, %v635_v1 }
 0x2f5   :  { %v779_v2 = vpop.f32.mrf.mxu0 }
 0x2f6   :  { %v780_v4 = vadd.f32 %v779_v2, %v635_v1 }
 0x2f8   :  { %v787_v5 = vcombine.low %v778_v3, %v780_v4 }
 0x2fa   :  { %794 = vst.msk [vmem:[#allocation2 + $0x8] sm:$0x77] %vm793_vm6, %v787_v5 }
 0x2fb   :  { %960 = shalt.err (!%p957_p4)
}
 0x2fc   :  { %804 = dma.vmem_to_hbm [thread:$0]  %s802_s30, 256, %s1323_s2, [#allocation3]  }
 0x2fd   :  { %969 = dma.done.wait [#allocation3], 256  }
 0x2fe   :  { %970 = vsyncadd [#allocation3], 4294967040 }
 0x2ff   :  { %808 = vsyncpa [#allocation3], 1 }

</bundles_post_ra>
